<compile_context>
chip_gen: v6e
topology: v6e:2x2x1
jax: 0.10.0
libtpu: 0.0.40
codegen_flags: <defaults>
</compile_context>

<pallas_src>
import jax
import jax.numpy as jnp
from jax import lax
from jax.experimental import pallas as pl
from jax.experimental.pallas import tpu as pltpu


# ----------------------------------------------------------------------------
# Pallas kernels
# ----------------------------------------------------------------------------
def _hard_swish_kernel(x_ref, o_ref):
    x = x_ref[...].astype(jnp.float32)
    o_ref[...] = (x * jnp.clip(x + 3.0, 0.0, 6.0) * (1.0 / 6.0)).astype(o_ref.dtype)


def _hard_sigmoid_kernel(x_ref, o_ref):
    x = x_ref[...].astype(jnp.float32)
    o_ref[...] = (jnp.clip(x + 3.0, 0.0, 6.0) * (1.0 / 6.0)).astype(o_ref.dtype)


def _bn_hswish_kernel(x_ref, s_ref, b_ref, o_ref):
    # out = hard_swish(x * scale + shift); scale/shift are (rows, 1), broadcast
    # along the lane axis.
    x = x_ref[...].astype(jnp.float32)
    s = s_ref[...].astype(jnp.float32)
    b = b_ref[...].astype(jnp.float32)
    y = x * s + b
    o_ref[...] = (y * jnp.clip(y + 3.0, 0.0, 6.0) * (1.0 / 6.0)).astype(o_ref.dtype)


def _se_scale_kernel(x_ref, g_ref, o_ref):
    # out = x * hard_sigmoid(g); g is (rows, 1), broadcast along the lane axis.
    x = x_ref[...].astype(jnp.float32)
    g = g_ref[...].astype(jnp.float32)
    gate = jnp.clip(g + 3.0, 0.0, 6.0) * (1.0 / 6.0)
    o_ref[...] = (x * gate).astype(o_ref.dtype)


# ----------------------------------------------------------------------------
# Elementwise dispatcher (lane-dense tiling, no whole-tensor padding)
# ----------------------------------------------------------------------------
_LANE = 128
_WIDTHS = (4096, 2048, 1024, 512, 256, 128)


def _pick_width(n):
    for w in _WIDTHS:
        if n % w == 0:
            return w
    return None


def _elementwise_pallas(body, x, *, max_block_bytes=2 * 1024 * 1024):
    """Apply an elementwise Pallas kernel to `x` (any shape, float dtype)."""
    if x.size == 0:
        return x
    orig_shape, dtype = x.shape, x.dtype
    flat = x.reshape(-1)
    n = flat.shape[0]
    itemsize = jnp.dtype(dtype).itemsize
    max_block_elems = max_block_bytes // itemsize

    width = _pick_width(n)
    if width is None:
        # Size not a multiple of 128 (never the case for PP-LCNet feature maps).
        if n <= max_block_elems:
            out = pl.pallas_call(
                body, out_shape=jax.ShapeDtypeStruct((1, n), dtype)
            )(flat.reshape(1, n))
            return out.reshape(orig_shape)
        # Large AND misaligned: pad by < 128 elements (not to a tile multiple).
        n_pad = ((n + _LANE - 1) // _LANE) * _LANE
        out = _elementwise_pallas(
            body, jnp.pad(flat, (0, n_pad - n)), max_block_bytes=max_block_bytes
        )
        return out[:n].reshape(orig_shape)

    rows = n // width

    # Fast path: whole slab as a single full-array block (covers all
    # PP-LCNet-sized activations) -> no grid, no per-step overhead, no padding.
    if rows * width * itemsize <= max(max_block_bytes, 8 * width * itemsize):
        x2d = flat.reshape(rows, width)
        out = pl.pallas_call(
            body, out_shape=jax.ShapeDtypeStruct((rows, width), dtype)
        )(x2d)
        return out.reshape(orig_shape)

    # Gridded path for large activations: ~max_block_bytes per lane-dense input
    # tile; pl.cdiv grid so the (possibly partial) last block is masked by
    # Pallas instead of pre-padding the tensor in HBM. In+out double-buffered
    # stays well inside the default scoped VMEM limit.
    block_rows = max(8, (max_block_elems // width) // 8 * 8)
    x2d = flat.reshape(rows, width)
    grid = (pl.cdiv(rows, block_rows),)
    out = pl.pallas_call(
        body,
        out_shape=jax.ShapeDtypeStruct((rows, width), dtype),
        grid_spec=pltpu.PrefetchScalarGridSpec(
            num_scalar_prefetch=0,
            grid=grid,
            in_specs=[pl.BlockSpec((block_rows, width), lambda i: (i, 0))],
            out_specs=pl.BlockSpec((block_rows, width), lambda i: (i, 0)),
        ),
        compiler_params=pltpu.CompilerParams(
            dimension_semantics=("parallel",),
        ),
    )(x2d)
    return out.reshape(orig_shape)


def hard_swish(x, **kw):
    return _elementwise_pallas(_hard_swish_kernel, x, **kw)


def hard_sigmoid(x, **kw):
    return _elementwise_pallas(_hard_sigmoid_kernel, x, **kw)


def bn_hswish(x, gamma, beta, mean, var, eps=1e-5):
    """Fused inference BatchNorm + HardSwish. x: (B, C, H, W)."""
    b, c, h, w = x.shape
    scale = gamma / jnp.sqrt(var + eps)
    shift = beta - mean * scale
    if x.size > (1 << 21):
        # Very large activation: XLA affine + gridded Pallas hswish.
        y = x * scale.reshape(1, -1, 1, 1) + shift.reshape(1, -1, 1, 1)
        return hard_swish(y)
    x2d = x.reshape(b * c, h * w)
    s2d = jnp.broadcast_to(scale.reshape(1, c), (b, c)).reshape(b * c, 1)
    t2d = jnp.broadcast_to(shift.reshape(1, c), (b, c)).reshape(b * c, 1)
    out = pl.pallas_call(
        _bn_hswish_kernel,
        out_shape=jax.ShapeDtypeStruct((b * c, h * w), x.dtype),
    )(x2d, s2d, t2d)
    return out.reshape(b, c, h, w)


def se_scale(x, gate):
    """Fused SE epilogue: x * hard_sigmoid(gate). x: (B,C,H,W), gate: (B,C,1,1)."""
    b, c, h, w = x.shape
    if x.size > (1 << 20):  # very large: fall back to unfused Pallas activation
        return x * hard_sigmoid(gate)
    x2d = x.reshape(b * c, h * w)
    g2d = gate.reshape(b * c, 1)
    out = pl.pallas_call(
        _se_scale_kernel,
        out_shape=jax.ShapeDtypeStruct((b * c, h * w), x.dtype),
    )(x2d, g2d)
    return out.reshape(b, c, h, w)


# ----------------------------------------------------------------------------
# PP-LCNet forward (convs / pooling / linear stay on XLA; epilogues use Pallas)
# ----------------------------------------------------------------------------
def _make_divisible(v, divisor=8, min_value=None):
    if min_value is None:
        min_value = divisor
    new_v = max(min_value, int(v + divisor / 2) // divisor * divisor)
    if new_v < 0.9 * v:
        new_v += divisor
    return new_v


_CFGS = [[3, 32, 1, 0], [3, 64, 2, 0], [3, 64, 1, 0], [3, 128, 2, 0],
         [3, 128, 1, 0], [5, 256, 2, 0], [5, 256, 1, 0], [5, 256, 1, 0],
         [5, 256, 1, 0], [5, 256, 1, 0], [5, 256, 1, 0], [5, 512, 2, 1],
         [5, 512, 1, 1]]
_SCALE = 0.25


def _conv2d(x, w, b=None, *, stride=1, padding=0, groups=1):
    dn = lax.conv_dimension_numbers(x.shape, w.shape, ("NCHW", "OIHW", "NCHW"))
    y = lax.conv_general_dilated(
        x, w, window_strides=(stride, stride),
        padding=[(padding, padding), (padding, padding)],
        dimension_numbers=dn, feature_group_count=groups)
    if b is not None:
        y = y + b.reshape(1, -1, 1, 1)
    return y


def _batch_norm(x, gamma, beta, mean, var, eps=1e-5):
    scale = gamma / jnp.sqrt(var + eps)
    shift = beta - mean * scale
    return x * scale.reshape(1, -1, 1, 1) + shift.reshape(1, -1, 1, 1)


def _conv_init(key, shape):
    fan_in = shape[1] * shape[2] * shape[3]
    return jax.random.normal(key, shape, jnp.float32) * (fan_in ** -0.5)


def _bn_init(c):
    return dict(gamma=jnp.ones((c,), jnp.float32), beta=jnp.zeros((c,), jnp.float32),
                mean=jnp.zeros((c,), jnp.float32), var=jnp.ones((c,), jnp.float32))


def build_pplcnet_params(key):
    ki = iter(jax.random.split(key, 64))
    params = {}
    c_in = _make_divisible(16 * _SCALE)
    params["stem_w"] = _conv_init(next(ki), (c_in, 3, 3, 3))
    blocks = []
    for k, c, s, use_se in _CFGS:
        c_out = _make_divisible(c * _SCALE)
        blk = {"kernel": k, "stride": s, "use_se": bool(use_se), "groups": c_in}
        blk["dw_w"] = _conv_init(next(ki), (c_in, 1, k, k))
        blk["bn1"] = _bn_init(c_in)
        if use_se:
            mid = _make_divisible(c_in // 4)
            blk["se_w1"] = _conv_init(next(ki), (mid, c_in, 1, 1))
            blk["se_b1"] = jnp.zeros((mid,), jnp.float32)
            blk["se_w2"] = _conv_init(next(ki), (c_in, mid, 1, 1))
            blk["se_b2"] = jnp.zeros((c_in,), jnp.float32)
        blk["pw_w"] = _conv_init(next(ki), (c_out, c_in, 1, 1))
        blk["bn2"] = _bn_init(c_out)
        blocks.append(blk)
        c_in = c_out
    params["blocks"] = blocks
    params["fc_w"] = _conv_init(next(ki), (1280, c_in, 1, 1))
    params["fc_b"] = jnp.zeros((1280,), jnp.float32)
    params["cls_w"] = jax.random.normal(next(ki), (2, 1280), jnp.float32) * (1280 ** -0.5)
    params["cls_b"] = jnp.zeros((2,), jnp.float32)
    return params


def _hswish_ref(x):
    return x * jnp.clip(x + 3.0, 0.0, 6.0) * (1.0 / 6.0)


def _hsigmoid_ref(x):
    return jnp.clip(x + 3.0, 0.0, 6.0) * (1.0 / 6.0)


def pplcnet_forward(params, x, *, use_pallas=True):
    hswish = hard_swish if use_pallas else _hswish_ref

    def bn_then_hswish(y, bn):
        if use_pallas:
            return bn_hswish(y, **bn)
        return _hswish_ref(_batch_norm(y, **bn))

    x = _conv2d(x, params["stem_w"], stride=2, padding=1)
    x = hswish(x)
    for blk in params["blocks"]:
        k, s, g = blk["kernel"], blk["stride"], blk["groups"]
        y = _conv2d(x, blk["dw_w"], stride=s, padding=(k - 1) // 2, groups=g)
        y = bn_then_hswish(y, blk["bn1"])                    # fused BN + HardSwish
        if blk["use_se"]:
            gate = jnp.mean(y, axis=(2, 3), keepdims=True)   # AdaptiveAvgPool2d(1)
            gate = _conv2d(gate, blk["se_w1"], blk["se_b1"])
            gate = jnp.maximum(gate, 0.0)                    # ReLU
            gate = _conv2d(gate, blk["se_w2"], blk["se_b2"])
            if use_pallas:
                y = se_scale(y, gate)                        # fused x * hard_sigmoid(gate)
            else:
                y = y * _hsigmoid_ref(gate)
        y = _conv2d(y, blk["pw_w"])
        y = bn_then_hswish(y, blk["bn2"])                    # fused BN + HardSwish
        x = y
    x = jnp.mean(x, axis=(2, 3), keepdims=True)              # AdaptiveAvgPool2d((1,1))
    x = _conv2d(x, params["fc_w"], params["fc_b"])
    x = hswish(x)
    # TODO(synk): dropout is inference-mode identity here (PyTorch p=0.2 only in train mode).
    x = x.reshape(x.shape[0], -1)
    return x @ params["cls_w"].T + params["cls_b"]


if __name__ == "__main__":
    root = jax.random.PRNGKey(0)
    k_params, k_x, k_a, k_b = jax.random.split(root, 4)

    params = build_pplcnet_params(k_params)
    x = jax.random.normal(k_x, (2, 3, 32, 32), dtype=jnp.float32)

    logits = jax.block_until_ready(pplcnet_forward(params, x, use_pallas=True))
    logits_ref = jax.block_until_ready(pplcnet_forward(params, x, use_pallas=False))
    assert logits.shape == (2, 2) and logits.dtype == jnp.float32
    assert jnp.allclose(logits, logits_ref, atol=1e-4, rtol=1e-4), "PPLCNet forward mismatch"

    # Exercise the gridded (multi-step) and partial-last-block paths of the
    # elementwise kernels on larger activations.
    a = jax.random.normal(k_a, (2, 8, 128, 128), dtype=jnp.float32) * 4.0
    ya = jax.block_until_ready(hard_sigmoid(a, max_block_bytes=64 * 1024))
    assert jnp.allclose(ya, _hsigmoid_ref(a), atol=1e-6), "hard_sigmoid grid path mismatch"

    b = jax.random.normal(k_b, (2, 5, 96, 128), dtype=jnp.float32) * 4.0
    yb = jax.block_until_ready(hard_swish(b, max_block_bytes=64 * 1024))
    assert jnp.allclose(yb, _hswish_ref(b), atol=1e-5, rtol=1e-5), "hard_swish partial-block mismatch"

    # Exercise the fused BN + HardSwish kernel directly.
    c = jax.random.normal(k_b, (2, 16, 8, 8), dtype=jnp.float32) * 3.0
    gamma = jnp.linspace(0.5, 1.5, 16, dtype=jnp.float32)
    beta = jnp.linspace(-0.2, 0.2, 16, dtype=jnp.float32)
    mean = jnp.linspace(-0.1, 0.1, 16, dtype=jnp.float32)
    var = jnp.linspace(0.8, 1.2, 16, dtype=jnp.float32)
    yc = jax.block_until_ready(bn_hswish(c, gamma, beta, mean, var))
    yc_ref = _hswish_ref(_batch_norm(c, gamma, beta, mean, var))
    assert jnp.allclose(yc, yc_ref, atol=1e-5, rtol=1e-5), "bn_hswish mismatch"

    print("KERNEL_OK")
</pallas_src>

<mosaic_0001>
module attributes {stable_mosaic.version = 11 : i64} {
  func.func @_hard_swish_kernel(%arg0: memref<1x4096xf32, #tpu.memory_space<vmem>>, %arg1: memref<1x4096xf32, #tpu.memory_space<vmem>>) attributes {dimension_semantics = [], scalar_prefetch = 0 : i64, scratch_operands = 0 : i64, tpu.core_type = #tpu.core_type<tc>} {
    %c0 = arith.constant 0 : index
    %c0_0 = arith.constant 0 : index
    %0 = vector.load %arg0[%c0, %c0_0] : memref<1x4096xf32, #tpu.memory_space<vmem>>, vector<1x4096xf32>
    %cst = arith.constant 3.000000e+00 : f32
    %1 = vector.broadcast %cst : f32 to vector<1x4096xf32>
    %2 = arith.addf %0, %1 : vector<1x4096xf32>
    %cst_1 = arith.constant 0.000000e+00 : f32
    %cst_2 = arith.constant 6.000000e+00 : f32
    %3 = vector.broadcast %cst_1 : f32 to vector<1x4096xf32>
    %4 = arith.maximumf %3, %2 : vector<1x4096xf32>
    %5 = vector.broadcast %cst_2 : f32 to vector<1x4096xf32>
    %6 = arith.minimumf %5, %4 : vector<1x4096xf32>
    %7 = arith.mulf %0, %6 : vector<1x4096xf32>
    %cst_3 = arith.constant 0.166666672 : f32
    %8 = vector.broadcast %cst_3 : f32 to vector<1x4096xf32>
    %9 = arith.mulf %7, %8 : vector<1x4096xf32>
    %c0_4 = arith.constant 0 : index
    %c0_5 = arith.constant 0 : index
    %10 = vector.load %arg1[%c0_4, %c0_5] : memref<1x4096xf32, #tpu.memory_space<vmem>>, vector<1x4096xf32>
    tpu.vector_store %arg1[%c0_4, %c0_5], %9 {strides = array<i32>} : memref<1x4096xf32, #tpu.memory_space<vmem>>, vector<1x4096xf32>,
    return
  }
}

</mosaic_0001>

<bundles_post_ra>
// kernel: tpu_custom_call.1
= control target key start
LH: loop header
LB: loop body
LE: loop exit
PB: predicated region body
PF: predicated region fallthrough
CT: control target
= control target key end

     0   :  { %6 = vsyncpa [#allocation3], 0  ;;  %s128_s0 = inlined_call_operand.hbm [shape: f32[1,4096], index: 0, kind: input, shape index: {}]   ;;  %s129_s1 = inlined_call_operand.hbm [shape: f32[1,4096], index: 1, kind: output, shape index: {}]  }
   0x1   :  { %7 = vsyncpa [#allocation4], 0  ;;  %s110_s6 = smov [#allocation2]  }
   0x2   :  { %s14_s7 = sshll.u32 %s110_s6, 4  ;;  %s15_s7 = int_to_ptr.vmem [resolvable:$true] %s14_s7 }
   0x3   :  { %s74_s8 = scalar_lea.vmem %s15_s7, 512  ;;  %p79_p1 = scmp.lt.s32.totalorder %s15_s7, %s15_s7 }
   0x4   :  { %p75_p0 = scmp.ne.s32.totalorder %s15_s7, %s74_s8  ;;  %p80_p2 = scmp.lt.s32.totalorder %s74_s8, %s74_s8 }
   0x6   :  { %p81_p3 = por %p80_p2, %p79_p1 }
   0x8   :  { %p82_p4 = pnand %p81_p3, %p75_p0 }
   0xa   :  { %85 = shalt.err (!%p82_p4)
}
   0xb   :  { %17 = dma.hbm_to_vmem [thread:$0]  %s128_s0, 512, %s15_s7, [#allocation3]  }
   0xc   :  { %106 = dma.done.wait [#allocation3], 512  }
   0xd   :  { %107 = vsyncadd [#allocation3], 4294966784  ;;  %v21_v0 = vld [vmem:[#allocation2] sm:$0xff]  ;;  %v22_v1 = vld [vmem:[#allocation2 + $0x8] sm:$0xff]  ;;  %s111_s0 = smov [#allocation5]  }
   0xe   :  { %v23_v2 = vld [vmem:[#allocation2 + $0x10] sm:$0xff]  ;;  %v25_v3 = vadd.f32 3.0, %v21_v0  ;;  %v26_v4 = vadd.f32 3.0, %v22_v1  ;;  %v24_v6 = vld [vmem:[#allocation2 + $0x18] sm:$0xff]  ;;  %s55_s11 = sshll.u32 %s111_s0, 4  ;;  %s56_s11 = int_to_ptr.vmem [resolvable:$true] %s55_s11 }
   0xf   :  { %v27_v5 = vadd.f32 3.0, %v23_v2  ;;  %v28_v7 = vadd.f32 3.0, %v24_v6  ;;  %s86_s12 = scalar_lea.vmem %s56_s11, 512  ;;  %p91_p6 = scmp.lt.s32.totalorder %s56_s11, %s56_s11 }
  0x10   :  { %v29_v8 = vmax.f32 %v25_v3, 0.0  ;;  %v30_v9 = vmax.f32 %v26_v4, 0.0  ;;  %p87_p5 = scmp.ne.s32.totalorder %s56_s11, %s86_s12  ;;  %p92_p7 = scmp.lt.s32.totalorder %s86_s12, %s86_s12 }
  0x11   :  { %v31_v10 = vmax.f32 %v27_v5, 0.0  ;;  %v32_v11 = vmax.f32 %v28_v7, 0.0 }
  0x12   :  { %v33_v12 = vmin.f32 %v29_v8, 6.0  ;;  %v34_v13 = vmin.f32 %v30_v9, 6.0  ;;  %p93_p8 = por %p92_p7, %p91_p6 }
  0x13   :  { %v35_v14 = vmin.f32 %v31_v10, 6.0  ;;  %v36_v15 = vmin.f32 %v32_v11, 6.0 }
  0x14   :  { %v37_v16 = vmul.f32 %v33_v12, %v21_v0  ;;  %v38_v17 = vmul.f32 %v34_v13, %v22_v1  ;;  %p94_p9 = pnand %p93_p8, %p87_p5 }
  0x15   :  { %v39_v18 = vmul.f32 %v35_v14, %v23_v2  ;;  %v40_v19 = vmul.f32 %v36_v15, %v24_v6 }
  0x16   :  { %v41_v20 = vmul.f32 0.16666667, %v37_v16  ;;  %v42_v21 = vmul.f32 0.16666667, %v38_v17 }
  0x17   :  { %v43_v22 = vmul.f32 0.16666667, %v39_v18  ;;  %v44_v23 = vmul.f32 0.16666667, %v40_v19 }
  0x18   :  { %45 = vst [vmem:[#allocation5] sm:$0xff] %v41_v20  ;;  %46 = vst [vmem:[#allocation5 + $0x8] sm:$0xff] %v42_v21 }
  0x19   :  { %47 = vst [vmem:[#allocation5 + $0x10] sm:$0xff] %v43_v22  ;;  %48 = vst [vmem:[#allocation5 + $0x18] sm:$0xff] %v44_v23 }
  0x1a   :  { %97 = shalt.err (!%p94_p9)
}
  0x1b   :  { %58 = dma.vmem_to_hbm [thread:$0]  %s56_s11, 512, %s129_s1, [#allocation4]  }
  0x1c   :  { %108 = dma.done.wait [#allocation4], 512  }
  0x1d   :  { %109 = vsyncadd [#allocation4], 4294966784 }
  0x1e   :  { %62 = vsyncpa [#allocation3], 1 }
  0x1f   :  { %63 = vsyncpa [#allocation4], 1 }

</bundles_post_ra>
